<compile_context>
chip_gen: v6e
topology: v6e:2x2x1
jax: 0.10.0
libtpu: 0.0.40
codegen_flags: <defaults>
</compile_context>

<pallas_src>
import functools

import numpy as np
import jax
import jax.numpy as jnp
from jax.experimental import pallas as pl
from jax.experimental.pallas import tpu as pltpu


# ---------------------------------------------------------------------------
# Host-side helpers (static, trace-time)
# ---------------------------------------------------------------------------
def _cdiv(a, b):
    return -(-a // b)


def _round_up(x, m):
    return _cdiv(x, m) * m


def _linear_interp_matrix_1d(in_size, out_size):
    """A[o, i]: align_corners=True linear interpolation weights, shape (out, in)."""
    if out_size == 1 or in_size == 1:
        src = np.zeros((out_size,), np.float64)
    else:
        src = np.arange(out_size, dtype=np.float64) * (in_size - 1) / (out_size - 1)
    i0 = np.clip(np.floor(src).astype(np.int64), 0, in_size - 1)
    i1 = np.minimum(i0 + 1, in_size - 1)
    w1 = src - i0
    w0 = 1.0 - w1
    A = np.zeros((out_size, in_size), np.float64)
    A[np.arange(out_size), i0] += w0
    A[np.arange(out_size), i1] += w1
    return A.astype(np.float32)  # keep weights in f32 (non-dyadic fractions)


@functools.lru_cache(maxsize=None)
def _tpu_vmem_capacity_bytes():
    try:
        return int(pltpu.get_tpu_info().vmem_capacity_bytes)
    except Exception:
        return 64 * 1024 * 1024  # conservative (v7x-sized) fallback


def _vmem_budget_bytes():
    # Generation-aware tile budget: ~28 MiB on v7x (64 MiB physical VMEM),
    # ~60 MiB on v5e/v6e (128 MiB physical), leaving Mosaic scratch headroom.
    cap = _tpu_vmem_capacity_bytes()
    return max(8 * 1024 * 1024, cap // 2 - 4 * 1024 * 1024)


def _vmem_limit_bytes():
    cap = _tpu_vmem_capacity_bytes()
    return int(min(cap - 8 * 1024 * 1024, _vmem_budget_bytes() + 8 * 1024 * 1024))


def _sublane(*itemsizes):
    return max({4: 8, 2: 16, 1: 32}.get(int(b), 8) for b in itemsizes)


def _pick_rows(M, sub, max_rows):
    """Row-tile (second-to-last block dim): multiple of `sub`, or the full dim."""
    if M <= sub:
        return M
    cap = max(sub, min(512, (max_rows // sub) * sub))
    if M >= 512:
        # >=2 row blocks so both v7x TensorCores get work; multiples of 256
        # match the v6e/v7x MXU row dimension.
        cap = max(sub, min(cap, _round_up(_cdiv(M, 2), 256)))
    nblk = _cdiv(M, cap)
    tm = _round_up(_cdiv(M, nblk), sub)          # near-full last tile
    return min(tm, M)                            # single block -> full dim


def _pick_lanes(S, max_lanes):
    """Lane-tile (last block dim): multiple of 128, or the full dim."""
    cap = max(128, (max_lanes // 128) * 128)
    if S <= cap:
        return S
    nblk = _cdiv(S, cap)
    return _round_up(_cdiv(S, nblk), 128)


# ---------------------------------------------------------------------------
# Pass 1: upsample along the LAST spatial axis.  Y(M, N) = X(M, K) @ A^T(K, N)
# ---------------------------------------------------------------------------
def _rmatmul_kernel(x_ref, a_ref, o_ref):
    o_ref[...] = jnp.dot(
        x_ref[...].astype(jnp.float32), a_ref[...],
        preferred_element_type=jnp.float32,
    ).astype(o_ref.dtype)


def _interp_last_axis(x2d, a_t, out_dtype):
    M, K = x2d.shape
    _, N = a_t.shape
    in_b = jnp.dtype(x2d.dtype).itemsize
    out_b = jnp.dtype(out_dtype).itemsize
    budget = _vmem_budget_bytes()

    # Keep the (small) per-axis interp matrix fully resident when it fits.
    if 2 * K * N * 4 <= budget // 2:
        tn = N
    else:
        tn = _pick_lanes(N, max(128, (budget // 2) // (2 * K * 4)))
    rows_budget = budget - 2 * K * tn * 4                      # A double-buffer
    tm_max = max(8, rows_budget // (2 * (K * in_b + tn * out_b)))
    tm = _pick_rows(M, _sublane(in_b, out_b), tm_max)

    gi, gj = _cdiv(M, tm), _cdiv(N, tn)
    cost = pl.CostEstimate(
        flops=2 * M * K * N,
        transcendentals=0,
        # X read once (block index constant over the inner j loop), A streamed
        # once per row block (usually resident: gj == 1), Y written once.
        bytes_accessed=int(in_b * M * K + 4 * gi * K * N + out_b * M * N),
    )
    return pl.pallas_call(
        _rmatmul_kernel,
        out_shape=jax.ShapeDtypeStruct((M, N), out_dtype),
        grid_spec=pltpu.PrefetchScalarGridSpec(
            num_scalar_prefetch=0,
            grid=(gi, gj),                        # ragged grid, no pad/slice
            in_specs=[
                pl.BlockSpec((tm, K), lambda i, j: (i, 0)),
                pl.BlockSpec((K, tn), lambda i, j: (0, j)),
            ],
            out_specs=pl.BlockSpec((tm, tn), lambda i, j: (i, j)),
        ),
        compiler_params=pltpu.CompilerParams(
            dimension_semantics=("parallel", "parallel"),
            vmem_limit_bytes=_vmem_limit_bytes(),
        ),
        cost_estimate=cost,
    )(x2d, a_t)


# ---------------------------------------------------------------------------
# Pass 2/3: upsample along a NON-last axis.  Y[p] = A(O, I) @ X[p](I, S)
# ---------------------------------------------------------------------------
def _lmatmul_kernel(a_ref, x_ref, o_ref):
    o_ref[...] = jnp.dot(
        a_ref[...], x_ref[...].astype(jnp.float32),
        preferred_element_type=jnp.float32,
    ).astype(o_ref.dtype)


def _interp_middle_axis(a, x3d, out_dtype):
    P, I, S = x3d.shape
    O = a.shape[0]
    in_b = jnp.dtype(x3d.dtype).itemsize
    out_b = jnp.dtype(out_dtype).itemsize
    budget = _vmem_budget_bytes()

    lane_budget = budget - 2 * O * I * 4                       # A double-buffer (tiny)
    ts_max = max(128, lane_budget // (2 * (I * in_b + O * out_b)))
    ts = _pick_lanes(S, ts_max)
    gs = _cdiv(S, ts)

    cost = pl.CostEstimate(
        flops=2 * P * O * I * S,
        transcendentals=0,
        bytes_accessed=int(4 * O * I + in_b * P * I * S + out_b * P * O * S),
    )
    return pl.pallas_call(
        _lmatmul_kernel,
        out_shape=jax.ShapeDtypeStruct((P, O, S), out_dtype),
        grid_spec=pltpu.PrefetchScalarGridSpec(
            num_scalar_prefetch=0,
            grid=(P, gs),
            in_specs=[
                pl.BlockSpec((O, I), lambda p, j: (0, 0)),          # resident
                pl.BlockSpec((None, I, ts), lambda p, j: (p, 0, j)),
            ],
            out_specs=pl.BlockSpec((None, O, ts), lambda p, j: (p, 0, j)),
        ),
        compiler_params=pltpu.CompilerParams(
            dimension_semantics=("parallel", "parallel"),
            vmem_limit_bytes=_vmem_limit_bytes(),
        ),
        cost_estimate=cost,
    )(a, x3d)


# ---------------------------------------------------------------------------
# Public forward (matches UpLinear.forward semantics)
# ---------------------------------------------------------------------------
def up_linear_forward(x, scale_factor, is_2d=None):
    """nn.Upsample(scale_factor, mode='bilinear'/'trilinear', align_corners=True).

    x: (N, C, H, W) or (N, C, D, H, W), PyTorch channels-first layout.
    Returns the upsampled tensor in the same layout and dtype.
    """
    spatial_in = tuple(int(s) for s in x.shape[2:])
    if is_2d is None:
        is_2d = len(spatial_in) == 2
    assert len(spatial_in) == (2 if is_2d else 3)
    d = len(spatial_in)
    spatial_out = tuple(int(np.floor(s * scale_factor)) for s in spatial_in)
    n, c = int(x.shape[0]), int(x.shape[1])
    out_dtype = x.dtype

    mats = [_linear_interp_matrix_1d(i, o) for i, o in zip(spatial_in, spatial_out)]

    # --- last spatial axis: lane-dense right matmul --------------------------
    prefix = n * c * int(np.prod(spatial_in[:-1], dtype=np.int64))
    cur = _interp_last_axis(
        x.reshape(prefix, spatial_in[-1]),        # free reshape of NC[D]HW layout
        jnp.asarray(mats[-1].T),                  # (W, Wo), f32
        out_dtype=jnp.float32 if d > 1 else out_dtype,
    )

    # --- remaining axes, last-but-one -> first: batched left matmuls ---------
    # Intermediates stay f32 for accuracy; only the final pass casts to x.dtype.
    for k in range(d - 2, -1, -1):
        P = n * c * int(np.prod(spatial_in[:k], dtype=np.int64))
        I = spatial_in[k]
        S = int(np.prod(spatial_out[k + 1:], dtype=np.int64))
        cur = _interp_middle_axis(
            jnp.asarray(mats[k]),                 # (Ok, Ik), f32
            cur.reshape(P, I, S),                 # free row-major reshape
            out_dtype=jnp.float32 if k > 0 else out_dtype,
        )
        cur = cur.reshape(P * spatial_out[k], S)

    return cur.reshape((n, c) + spatial_out)


# ---------------------------------------------------------------------------
# Pure-JAX reference (separable contraction, HIGHEST precision)
# ---------------------------------------------------------------------------
def _reference_upsample(x, scale_factor):
    spatial_in = x.shape[2:]
    spatial_out = tuple(int(s * scale_factor) for s in spatial_in)
    mats = [
        jnp.asarray(_linear_interp_matrix_1d(i, o), jnp.float32)
        for i, o in zip(spatial_in, spatial_out)
    ]
    hp = jax.lax.Precision.HIGHEST
    if len(spatial_in) == 2:
        return jnp.einsum("ph,qw,nchw->ncpq", mats[0], mats[1], x, precision=hp)
    return jnp.einsum(
        "pd,qh,rw,ncdhw->ncpqr", mats[0], mats[1], mats[2], x, precision=hp
    )


if __name__ == "__main__":
    key = jax.random.PRNGKey(0)
    k1, k2, k3 = jax.random.split(key, 3)
    scale = 2

    # --- 2-D bilinear, align_corners=True (primary case) --------------------
    x2 = jax.random.normal(k1, (2, 4, 16, 16), dtype=jnp.float32)
    y2 = jax.block_until_ready(up_linear_forward(x2, scale, is_2d=True))
    assert y2.shape == (2, 4, 32, 32)
    assert y2.dtype == x2.dtype
    assert jnp.allclose(y2, _reference_upsample(x2, scale), atol=2e-2, rtol=2e-2)
    # align_corners=True => output corners reproduce the input corners
    assert jnp.allclose(y2[..., 0, 0], x2[..., 0, 0], atol=2e-2)
    assert jnp.allclose(y2[..., -1, -1], x2[..., -1, -1], atol=2e-2)

    # --- 2-D, awkward spatial size (exercises ragged-grid path) -------------
    x2b = jax.random.normal(k2, (2, 3, 7, 7), dtype=jnp.float32)
    y2b = jax.block_until_ready(up_linear_forward(x2b, scale, is_2d=True))
    assert y2b.shape == (2, 3, 14, 14)
    assert jnp.allclose(y2b, _reference_upsample(x2b, scale), atol=2e-2, rtol=2e-2)

    # --- 3-D trilinear -------------------------------------------------------
    x3 = jax.random.normal(k3, (1, 2, 4, 6, 6), dtype=jnp.float32)
    y3 = jax.block_until_ready(up_linear_forward(x3, scale, is_2d=False))
    assert y3.shape == (1, 2, 8, 12, 12)
    assert jnp.allclose(y3, _reference_upsample(x3, scale), atol=2e-2, rtol=2e-2)

    print("KERNEL_OK")
</pallas_src>

<mosaic_0001>
module attributes {stable_mosaic.version = 11 : i64} {
  func.func @_rmatmul_kernel(%arg0: i32, %arg1: i32, %arg2: memref<128x16xf32, #tpu.memory_space<vmem>>, %arg3: memref<16x32xf32, #tpu.memory_space<vmem>>, %arg4: memref<128x32xf32, #tpu.memory_space<vmem>>) attributes {dimension_semantics = [#tpu.dimension_semantics<parallel>, #tpu.dimension_semantics<parallel>], iteration_bounds = array<i64: 1, 1>, scalar_prefetch = 0 : i64, scratch_operands = 0 : i64, tpu.core_type = #tpu.core_type<tc>, window_params = [{transform_indices = @transform_0, window_bounds = array<i64: 128, 16>}, {transform_indices = @transform_1, window_bounds = array<i64: 16, 32>}, {transform_indices = @transform_2, window_bounds = array<i64: 128, 32>}]} {
    %c0 = arith.constant 0 : index
    %c0_0 = arith.constant 0 : index
    %0 = vector.load %arg2[%c0, %c0_0] : memref<128x16xf32, #tpu.memory_space<vmem>>, vector<128x16xf32>
    %c0_1 = arith.constant 0 : index
    %c0_2 = arith.constant 0 : index
    %1 = vector.load %arg3[%c0_1, %c0_2] : memref<16x32xf32, #tpu.memory_space<vmem>>, vector<16x32xf32>
    %cst = arith.constant dense<0.000000e+00> : vector<128x32xf32>
    %2 = tpu.matmul %0, %1, %cst {dimension_numbers = #tpu.dot_dimension_numbers<[1], [0], [0], [1], [0, 0, 1, 1], [], []>} : vector<128x16xf32>, vector<16x32xf32>, vector<128x32xf32> -> vector<128x32xf32>
    %c0_3 = arith.constant 0 : index
    %c0_4 = arith.constant 0 : index
    %3 = vector.load %arg4[%c0_3, %c0_4] : memref<128x32xf32, #tpu.memory_space<vmem>>, vector<128x32xf32>
    tpu.vector_store %arg4[%c0_3, %c0_4], %2 {strides = array<i32>} : memref<128x32xf32, #tpu.memory_space<vmem>>, vector<128x32xf32>,
    return
  }
  func.func @transform_0(%arg0: i32, %arg1: i32) -> (i32, i32) {
    %c0_i32 = arith.constant 0 : i32
    %c0_i32_0 = arith.constant 0 : i32
    return %arg0, %c0_i32 : i32, i32
  }
  func.func @transform_1(%arg0: i32, %arg1: i32) -> (i32, i32) {
    %c0_i32 = arith.constant 0 : i32
    %c0_i32_0 = arith.constant 0 : i32
    return %c0_i32, %arg1 : i32, i32
  }
  func.func @transform_2(%arg0: i32, %arg1: i32) -> (i32, i32) {
    %c0_i32 = arith.constant 0 : i32
    return %arg0, %arg1 : i32, i32
  }
}

</mosaic_0001>

<bundles_post_ra>
// kernel: tpu_custom_call.1
= control target key start
LH: loop header
LB: loop body
LE: loop exit
PB: predicated region body
PF: predicated region fallthrough
CT: control target
= control target key end

     0   :  { %vm29_vm0 = vcmask 130048   ;;  %vm223_vm1 = vcmask 261120   ;;  %s459_s1 = inlined_call_operand.vmem [shape: f32[16,32], index: 1, kind: input, shape index: {}]   ;;  %s460_s0 = inlined_call_operand.vmem [shape: f32[128,16], index: 0, kind: input, shape index: {}]   ;;  %s461_s2 = inlined_call_operand.vmem [shape: f32[128,32], index: 2, kind: output, shape index: {}]  }
   0x1   :  { %v28_v0 = vld [vmem:[%s459_s1 + $0x8] sm:$0xff]  ;;  %v27_v1 = vld [vmem:[%s459_s1] sm:$0xff]  ;;  %v13_v6 = vld [vmem:[%s460_s0 + $0x10] sm:$0xff] }
   0x2   :  { %278 = vmatprep.subr.mxu0 %v28_v0  ;;  %306 = vmatprep.subr.mxu1 %v28_v0  ;;  %v11_v2 = vld [vmem:[%s460_s0] sm:$0xff]  ;;  %v12_v4 = vld [vmem:[%s460_s0 + $0x8] sm:$0xff]  ;;  %v21_v7 = vld [vmem:[%s460_s0 + $0x50] sm:$0xff] }
   0x3   :  { %279 = vmatpush3.msra.mxu0 %v28_v0  ;;  %308 = vmatpush3.msra.mxu1 %v28_v0  ;;  %v19_v3 = vld [vmem:[%s460_s0 + $0x40] sm:$0xff]  ;;  %v20_v5 = vld [vmem:[%s460_s0 + $0x48] sm:$0xff]  ;;  %v14_v8 = vld [vmem:[%s460_s0 + $0x18] sm:$0xff] }
   0x4   :  { %280 = vmatprep.subr.mxu0 %v27_v1  ;;  %307 = vmatprep.subr.mxu1 %v27_v1  ;;  %v22_v9 = vld [vmem:[%s460_s0 + $0x58] sm:$0xff]  ;;  %v15_v10 = vld [vmem:[%s460_s0 + $0x20] sm:$0xff]  ;;  %v16_v12 = vld [vmem:[%s460_s0 + $0x28] sm:$0xff] }
   0x5   :  { %281 = vmatpush3.msra.mxu0 %v27_v1  ;;  %309 = vmatpush3.msra.mxu1 %v27_v1  ;;  %v23_v11 = vld [vmem:[%s460_s0 + $0x60] sm:$0xff]  ;;  %v24_v13 = vld [vmem:[%s460_s0 + $0x68] sm:$0xff]  ;;  %v17_v14 = vld [vmem:[%s460_s0 + $0x30] sm:$0xff] }
   0x6   :  { %282 = vmatprep.mubr.msk.f32.mxu0 %vm29_vm0, %v11_v2  ;;  %294 = vmatprep.mubr.msk.f32.mxu1 %vm29_vm0, %v19_v3  ;;  %v25_v15 = vld [vmem:[%s460_s0 + $0x70] sm:$0xff]  ;;  %v18_v16 = vld [vmem:[%s460_s0 + $0x38] sm:$0xff] }
   0x7   :  { %283 = vmatmul.mubr.msk.f32.vlgmr.msra.gmra.mxu0 %vm29_vm0, %v12_v4  ;;  %295 = vmatmul.mubr.msk.f32.vlgmr.msra.gmra.mxu1 %vm29_vm0, %v20_v5  ;;  %v26_v17 = vld [vmem:[%s460_s0 + $0x78] sm:$0xff] }
   0x8   :  { %285 = vmatprep.mubr.msk.f32.mxu0 %vm29_vm0, %v13_v6  ;;  %297 = vmatprep.mubr.msk.f32.mxu1 %vm29_vm0, %v21_v7 }
   0xb   :  { %286 = vmatmul.mubr.msk.f32.gmra.mxu0 %vm29_vm0, %v14_v8  ;;  %298 = vmatmul.mubr.msk.f32.gmra.mxu1 %vm29_vm0, %v22_v9 }
   0xc   :  { %288 = vmatprep.mubr.msk.f32.mxu0 %vm29_vm0, %v15_v10  ;;  %300 = vmatprep.mubr.msk.f32.mxu1 %vm29_vm0, %v23_v11 }
   0xf   :  { %289 = vmatmul.mubr.msk.f32.gmra.mxu0 %vm29_vm0, %v16_v12  ;;  %301 = vmatmul.mubr.msk.f32.gmra.mxu1 %vm29_vm0, %v24_v13 }
  0x10   :  { %291 = vmatprep.mubr.msk.f32.mxu0 %vm29_vm0, %v17_v14  ;;  %303 = vmatprep.mubr.msk.f32.mxu1 %vm29_vm0, %v25_v15 }
  0x13   :  { %292 = vmatmul.mubr.msk.f32.gmra.mxu0 %vm29_vm0, %v18_v16  ;;  %304 = vmatmul.mubr.msk.f32.gmra.mxu1 %vm29_vm0, %v26_v17 }
  0xc7   :  { %v284_v18 = vpop.f32.mrf.mxu0  ;;  %v296_v19 = vpop.f32.mrf.mxu1 }
  0xc8   :  { %225 = vst.msk [vmem:[%s461_s2 + $0x8] sm:$0xff] %vm223_vm1, %v284_v18  ;;  %233 = vst.msk [vmem:[%s461_s2 + $0x48] sm:$0xff] %vm223_vm1, %v296_v19 }
  0xc9   :  { %v144_v20 = vpop.f32.mrf.mxu0  ;;  %v184_v21 = vpop.f32.mrf.mxu1 }
  0xca   :  { %224 = vst.msk [vmem:[%s461_s2] sm:$0xff] %vm223_vm1, %v144_v20  ;;  %232 = vst.msk [vmem:[%s461_s2 + $0x40] sm:$0xff] %vm223_vm1, %v184_v21 }
  0xcb   :  { %v287_v22 = vpop.f32.mrf.mxu0  ;;  %v299_v23 = vpop.f32.mrf.mxu1 }
  0xcc   :  { %227 = vst.msk [vmem:[%s461_s2 + $0x18] sm:$0xff] %vm223_vm1, %v287_v22  ;;  %235 = vst.msk [vmem:[%s461_s2 + $0x58] sm:$0xff] %vm223_vm1, %v299_v23 }
  0xcd   :  { %v154_v24 = vpop.f32.mrf.mxu0  ;;  %v194_v25 = vpop.f32.mrf.mxu1 }
  0xce   :  { %226 = vst.msk [vmem:[%s461_s2 + $0x10] sm:$0xff] %vm223_vm1, %v154_v24  ;;  %234 = vst.msk [vmem:[%s461_s2 + $0x50] sm:$0xff] %vm223_vm1, %v194_v25 }
  0xcf   :  { %v290_v26 = vpop.f32.mrf.mxu0  ;;  %v302_v27 = vpop.f32.mrf.mxu1 }
  0xd0   :  { %229 = vst.msk [vmem:[%s461_s2 + $0x28] sm:$0xff] %vm223_vm1, %v290_v26  ;;  %237 = vst.msk [vmem:[%s461_s2 + $0x68] sm:$0xff] %vm223_vm1, %v302_v27 }
  0xd1   :  { %v164_v28 = vpop.f32.mrf.mxu0  ;;  %v204_v29 = vpop.f32.mrf.mxu1 }
  0xd2   :  { %228 = vst.msk [vmem:[%s461_s2 + $0x20] sm:$0xff] %vm223_vm1, %v164_v28  ;;  %236 = vst.msk [vmem:[%s461_s2 + $0x60] sm:$0xff] %vm223_vm1, %v204_v29 }
  0xd3   :  { %v293_v30 = vpop.f32.mrf.mxu0  ;;  %v305_v31 = vpop.f32.mrf.mxu1 }
  0xd4   :  { %231 = vst.msk [vmem:[%s461_s2 + $0x38] sm:$0xff] %vm223_vm1, %v293_v30  ;;  %239 = vst.msk [vmem:[%s461_s2 + $0x78] sm:$0xff] %vm223_vm1, %v305_v31 }
  0xd5   :  { %v174_v32 = vpop.f32.mrf.mxu0  ;;  %v214_v33 = vpop.f32.mrf.mxu1 }
  0xd6   :  { %230 = vst.msk [vmem:[%s461_s2 + $0x30] sm:$0xff] %vm223_vm1, %v174_v32  ;;  %238 = vst.msk [vmem:[%s461_s2 + $0x70] sm:$0xff] %vm223_vm1, %v214_v33 }

</bundles_post_ra>
